<compile_context>
chip_gen: v7x
topology: tpu7x:2x2x1
jax: 0.10.0
libtpu: 0.0.40
codegen_flags: <defaults>
</compile_context>

<pallas_src>
import functools

import jax
import jax.numpy as jnp
from jax import lax
from jax.experimental import pallas as pl
from jax.experimental.pallas import tpu as pltpu


# ----------------------------------------------------------------------------
# Pass 1: streaming mean over L  +  excitation FC at the final grid step
# ----------------------------------------------------------------------------
def _se_reduce_excite_kernel(x_ref, w1_ref, w2_ref, gate_ref, acc_ref, *,
                             inv_len, total_rows, tile_rows, batch, chans,
                             need_mask):
    """x_ref   : (tile_rows, N*C) current L-tile of x (lane-dense view)
    w1_ref  : (C, n)  fc1.weight^T  (resident across all tiles)
    w2_ref  : (n, C)  fc2.weight^T  (resident across all tiles)
    gate_ref: (1, N*C) f32 output, written only at the last grid step
    acc_ref : (1, N*C) f32 scratch accumulator (persists across grid steps)
    """
    step = pl.program_id(0)

    @pl.when(step == 0)
    def _init():
        acc_ref[...] = jnp.zeros_like(acc_ref)

    xt = x_ref[...].astype(jnp.float32)                      # (tile_rows, N*C)
    if need_mask:  # statically elided when tile_rows divides L
        row = lax.broadcasted_iota(jnp.int32, xt.shape, 0) + step * tile_rows
        xt = jnp.where(row < total_rows, xt, 0.0)
    acc_ref[...] += jnp.sum(xt, axis=0, keepdims=True)       # sublane reduce

    @pl.when(step == pl.num_programs(0) - 1)
    def _excite():
        w1 = w1_ref[...]
        w2 = w2_ref[...]
        for b in range(batch):              # static unroll; tiny, off hot path
            lo, hi = b * chans, (b + 1) * chans
            pooled_b = acc_ref[:, lo:hi] * inv_len           # (1, C) f32 mean
            h = jnp.dot(pooled_b, w1, preferred_element_type=jnp.float32)
            h = jnp.maximum(h, 0.0)                          # ReLU
            g = jnp.dot(h, w2, preferred_element_type=jnp.float32)
            gate_ref[:, lo:hi] = jax.nn.sigmoid(g)           # sigmoid on EUP


# ----------------------------------------------------------------------------
# Pass 2: broadcast scale, memory-bound streaming
# ----------------------------------------------------------------------------
def _se_scale_kernel(x_ref, gate_ref, o_ref):
    """o = x * gate, gate broadcast over the tile's rows (lane-dense store)."""
    o_ref[...] = (x_ref[...].astype(jnp.float32) * gate_ref[...]).astype(o_ref.dtype)


# ----------------------------------------------------------------------------
# Wrapper
# ----------------------------------------------------------------------------
def _choose_tile_rows(num_rows, lane_width, itemsize, max_tile_rows,
                      tile_byte_budget=2 * 1024 * 1024):
    """Tile height capped by max_tile_rows and a ~2 MiB per-tile byte budget;
    multiple of 8 sublanes unless the tile covers all rows."""
    rows_budget = max(8, tile_byte_budget // max(1, lane_width * itemsize))
    tile = min(num_rows, max_tile_rows, rows_budget)
    if tile < num_rows:
        tile = max(8, (tile // 8) * 8)
    return tile


def se_block_forward(x, w1t, w2t, *, max_tile_rows=1024):
    """x: (L, N, C) sequence-major input. w1t=(C,n)=fc1.weight.T, w2t=(n,C)=fc2.weight.T.
    Returns (L, N, C) = x * sigmoid(fc2(relu(fc1(mean_L x)))).
    """
    L, N, C = x.shape
    NC = N * C
    n = w1t.shape[1]
    assert w1t.shape == (C, n) and w2t.shape == (n, C)

    # Lane-dense view: collapse the contiguous (N, C) trailing dims (free
    # reshape). Best performance when N*C is a multiple of 128 (unmasked vst);
    # pad channels upstream if it is not.
    x2d = x.reshape(L, NC)

    itemsize = jnp.dtype(x.dtype).itemsize
    tile_rows = _choose_tile_rows(L, NC, itemsize, max_tile_rows)
    num_tiles = pl.cdiv(L, tile_rows)
    need_mask = (L % tile_rows) != 0

    # VMEM budget: double-buffered in/out tiles + weights/gate/acc + slack.
    tile_bytes = tile_rows * NC * itemsize
    vmem_limit = int(min(48 * 2**20, max(16 * 2**20, 6 * tile_bytes + 2 * 2**20)))

    # ---- pass 1: pooled mean over L + excitation gate ------------------------
    gate = pl.pallas_call(
        functools.partial(
            _se_reduce_excite_kernel,
            inv_len=1.0 / L, total_rows=L, tile_rows=tile_rows,
            batch=N, chans=C, need_mask=need_mask),
        grid=(num_tiles,),
        in_specs=[
            pl.BlockSpec((tile_rows, NC), lambda i: (i, 0)),   # streamed x tiles
            pl.BlockSpec((C, n), lambda i: (0, 0)),            # resident fc1.W^T
            pl.BlockSpec((n, C), lambda i: (0, 0)),            # resident fc2.W^T
        ],
        out_specs=pl.BlockSpec((1, NC), lambda i: (0, 0)),      # resident gate
        out_shape=jax.ShapeDtypeStruct((1, NC), jnp.float32),
        scratch_shapes=[pltpu.VMEM((1, NC), jnp.float32)],
        compiler_params=pltpu.CompilerParams(
            dimension_semantics=("arbitrary",),                 # reduction axis
            vmem_limit_bytes=vmem_limit),
    )(x2d, w1t, w2t)

    # ---- pass 2: broadcast scale (mem-bound streaming) ------------------------
    # TODO(synk): optionally alias x2d -> out (input_output_aliases={0: 0}) to
    # halve HBM footprint once the caller guarantees x is donatable.
    out2d = pl.pallas_call(
        _se_scale_kernel,
        grid=(num_tiles,),
        in_specs=[
            pl.BlockSpec((tile_rows, NC), lambda i: (i, 0)),    # streamed x tiles
            pl.BlockSpec((1, NC), lambda i: (0, 0)),            # resident gate
        ],
        out_specs=pl.BlockSpec((tile_rows, NC), lambda i: (i, 0)),
        out_shape=jax.ShapeDtypeStruct((L, NC), x.dtype),
        compiler_params=pltpu.CompilerParams(
            dimension_semantics=("parallel",),                  # megacore on v7x
            vmem_limit_bytes=vmem_limit),
    )(x2d, gate)

    return out2d.reshape(L, N, C)


# ----------------------------------------------------------------------------
if __name__ == "__main__":
    # SEBlock(num_feature=32, r=4) on a (seq=192, batch=4, channels=32) input.
    L, N = 192, 4
    num_feature, r = 32, 4
    n = num_feature // r                 # bottleneck = 8; N * C = 128 lanes

    root = jax.random.PRNGKey(0)
    k_x, k_w1, k_w2 = jax.random.split(root, 3)

    x = jax.random.normal(k_x, (L, N, num_feature), jnp.float32)  # (seq, batch, C)
    # PyTorch Linear(bias=False): y = x @ W^T; pass W^T directly.
    w1t = jax.random.normal(k_w1, (num_feature, n), jnp.float32) * 0.2   # fc1.weight.T
    w2t = jax.random.normal(k_w2, (n, num_feature), jnp.float32) * 0.2   # fc2.weight.T

    # Small max_tile_rows so the demo actually exercises the L-streaming grid
    # (3 tiles of 64 rows per pass); production callers can leave the default.
    y = se_block_forward(x, w1t, w2t, max_tile_rows=64)
    y = jax.block_until_ready(y)

    # pure-JAX reference mirroring the PyTorch forward exactly
    pooled = jnp.mean(x, axis=0)                     # AdaptiveAvgPool1d over seq
    se = jnp.maximum(pooled @ w1t, 0.0)              # fc1 + ReLU
    se = jax.nn.sigmoid(se @ w2t)                    # fc2 + Sigmoid
    ref = x * se[None, :, :]                         # channel-wise rescale

    assert y.shape == (L, N, num_feature)
    assert jnp.allclose(y, ref, atol=1e-4, rtol=1e-4), "mismatch vs reference"

    print("KERNEL_OK")
</pallas_src>

<mosaic_0001>
module attributes {stable_mosaic.version = 11 : i64} {
  func.func @_se_reduce_excite_kernel(%arg0: i32, %arg1: memref<64x128xf32, #tpu.memory_space<vmem>>, %arg2: memref<32x8xf32, #tpu.memory_space<vmem>>, %arg3: memref<8x32xf32, #tpu.memory_space<vmem>>, %arg4: memref<1x128xf32, #tpu.memory_space<vmem>>, %arg5: memref<1x128xf32, #tpu.memory_space<vmem>>) attributes {dimension_semantics = [#tpu.dimension_semantics<arbitrary>], iteration_bounds = array<i64: 3>, scalar_prefetch = 0 : i64, scratch_operands = 1 : i64, tpu.core_type = #tpu.core_type<tc>, window_params = [{transform_indices = @transform_0, window_bounds = array<i64: 64, 128>}, {pipeline_mode = #tpu.pipeline_mode<synchronous>, transform_indices = @transform_1, window_bounds = array<i64: 32, 8>}, {pipeline_mode = #tpu.pipeline_mode<synchronous>, transform_indices = @transform_2, window_bounds = array<i64: 8, 32>}, {pipeline_mode = #tpu.pipeline_mode<synchronous>, transform_indices = @transform_3, window_bounds = array<i64: 1, 128>}]} {
    %c0_i32 = arith.constant 0 : i32
    %0 = arith.cmpi eq, %arg0, %c0_i32 : i32
    %1 = arith.extui %0 : i1 to i32
    %c0_i32_0 = arith.constant 0 : i32
    %2 = arith.cmpi ne, %1, %c0_i32_0 : i32
    scf.if %2 {
      %cst_7 = arith.constant 0.000000e+00 : f32
      %12 = vector.broadcast %cst_7 : f32 to vector<1x128xf32>
      %c0_8 = arith.constant 0 : index
      %c0_9 = arith.constant 0 : index
      %13 = vector.load %arg5[%c0_8, %c0_9] : memref<1x128xf32, #tpu.memory_space<vmem>>, vector<1x128xf32>
      tpu.vector_store %arg5[%c0_8, %c0_9], %12 {strides = array<i32>} : memref<1x128xf32, #tpu.memory_space<vmem>>, vector<1x128xf32>,
    } else {
    }
    %c0 = arith.constant 0 : index
    %c0_1 = arith.constant 0 : index
    %3 = vector.load %arg1[%c0, %c0_1] : memref<64x128xf32, #tpu.memory_space<vmem>>, vector<64x128xf32>
    %c0_2 = arith.constant 0 : index
    %c0_3 = arith.constant 0 : index
    %4 = vector.load %arg5[%c0_2, %c0_3] : memref<1x128xf32, #tpu.memory_space<vmem>>, vector<1x128xf32>
    %cst = arith.constant dense<0.000000e+00> : vector<128xf32>
    %5 = vector.multi_reduction <add>, %3, %cst [0] : vector<64x128xf32> to vector<128xf32>
    %6 = vector.shape_cast %5 : vector<128xf32> to vector<1x128xf32>
    %7 = arith.addf %4, %6 : vector<1x128xf32>
    %c0_4 = arith.constant 0 : index
    %c0_5 = arith.constant 0 : index
    %8 = vector.load %arg5[%c0_4, %c0_5] : memref<1x128xf32, #tpu.memory_space<vmem>>, vector<1x128xf32>
    tpu.vector_store %arg5[%c0_4, %c0_5], %7 {strides = array<i32>} : memref<1x128xf32, #tpu.memory_space<vmem>>, vector<1x128xf32>,
    %c2_i32 = arith.constant 2 : i32
    %9 = arith.cmpi eq, %arg0, %c2_i32 : i32
    %10 = arith.extui %9 : i1 to i32
    %c0_i32_6 = arith.constant 0 : i32
    %11 = arith.cmpi ne, %10, %c0_i32_6 : i32
    scf.if %11 {
      %c0_7 = arith.constant 0 : index
      %c0_8 = arith.constant 0 : index
      %12 = vector.load %arg2[%c0_7, %c0_8] : memref<32x8xf32, #tpu.memory_space<vmem>>, vector<32x8xf32>
      %c0_9 = arith.constant 0 : index
      %c0_10 = arith.constant 0 : index
      %13 = vector.load %arg3[%c0_9, %c0_10] : memref<8x32xf32, #tpu.memory_space<vmem>>, vector<8x32xf32>
      %c0_11 = arith.constant 0 : index
      %c0_12 = arith.constant 0 : index
      %14 = vector.load %arg5[%c0_11, %c0_12] : memref<1x128xf32, #tpu.memory_space<vmem>>, vector<1x32xf32>
      %cst_13 = arith.constant 0.00520833349 : f32
      %15 = vector.broadcast %cst_13 : f32 to vector<1x32xf32>
      %16 = arith.mulf %14, %15 : vector<1x32xf32>
      %cst_14 = arith.constant dense<0.000000e+00> : vector<1x8xf32>
      %17 = tpu.matmul %16, %12, %cst_14 {dimension_numbers = #tpu.dot_dimension_numbers<[1], [0], [0], [1], [0, 0, 1, 1], [], []>} : vector<1x32xf32>, vector<32x8xf32>, vector<1x8xf32> -> vector<1x8xf32>
      %cst_15 = arith.constant 0.000000e+00 : f32
      %18 = vector.broadcast %cst_15 : f32 to vector<1x8xf32>
      %19 = arith.maximumf %17, %18 : vector<1x8xf32>
      %cst_16 = arith.constant dense<0.000000e+00> : vector<1x32xf32>
      %20 = tpu.matmul %19, %13, %cst_16 {dimension_numbers = #tpu.dot_dimension_numbers<[1], [0], [0], [1], [0, 0, 1, 1], [], []>} : vector<1x8xf32>, vector<8x32xf32>, vector<1x32xf32> -> vector<1x32xf32>
      %21 = arith.negf %20 : vector<1x32xf32>
      %22 = math.exp %21 : vector<1x32xf32>
      %cst_17 = arith.constant 1.000000e+00 : f32
      %23 = vector.broadcast %cst_17 : f32 to vector<1x32xf32>
      %24 = arith.addf %23, %22 : vector<1x32xf32>
      %25 = arith.divf %23, %24 : vector<1x32xf32>
      %c0_18 = arith.constant 0 : index
      %c0_19 = arith.constant 0 : index
      %26 = vector.load %arg4[%c0_18, %c0_19] : memref<1x128xf32, #tpu.memory_space<vmem>>, vector<1x32xf32>
      tpu.vector_store %arg4[%c0_18, %c0_19], %25 {strides = array<i32>} : memref<1x128xf32, #tpu.memory_space<vmem>>, vector<1x32xf32>,
      %c0_20 = arith.constant 0 : index
      %c32 = arith.constant 32 : index
      %27 = vector.load %arg5[%c0_20, %c32] : memref<1x128xf32, #tpu.memory_space<vmem>>, vector<1x32xf32>
      %cst_21 = arith.constant 0.00520833349 : f32
      %28 = vector.broadcast %cst_21 : f32 to vector<1x32xf32>
      %29 = arith.mulf %27, %28 : vector<1x32xf32>
      %cst_22 = arith.constant dense<0.000000e+00> : vector<1x8xf32>
      %30 = tpu.matmul %29, %12, %cst_22 {dimension_numbers = #tpu.dot_dimension_numbers<[1], [0], [0], [1], [0, 0, 1, 1], [], []>} : vector<1x32xf32>, vector<32x8xf32>, vector<1x8xf32> -> vector<1x8xf32>
      %cst_23 = arith.constant 0.000000e+00 : f32
      %31 = vector.broadcast %cst_23 : f32 to vector<1x8xf32>
      %32 = arith.maximumf %30, %31 : vector<1x8xf32>
      %cst_24 = arith.constant dense<0.000000e+00> : vector<1x32xf32>
      %33 = tpu.matmul %32, %13, %cst_24 {dimension_numbers = #tpu.dot_dimension_numbers<[1], [0], [0], [1], [0, 0, 1, 1], [], []>} : vector<1x8xf32>, vector<8x32xf32>, vector<1x32xf32> -> vector<1x32xf32>
      %34 = arith.negf %33 : vector<1x32xf32>
      %35 = math.exp %34 : vector<1x32xf32>
      %cst_25 = arith.constant 1.000000e+00 : f32
      %36 = vector.broadcast %cst_25 : f32 to vector<1x32xf32>
      %37 = arith.addf %36, %35 : vector<1x32xf32>
      %38 = arith.divf %36, %37 : vector<1x32xf32>
      %c0_26 = arith.constant 0 : index
      %c32_27 = arith.constant 32 : index
      %39 = vector.load %arg4[%c0_26, %c32_27] : memref<1x128xf32, #tpu.memory_space<vmem>>, vector<1x32xf32>
      tpu.vector_store %arg4[%c0_26, %c32_27], %38 {strides = array<i32>} : memref<1x128xf32, #tpu.memory_space<vmem>>, vector<1x32xf32>,
      %c0_28 = arith.constant 0 : index
      %c64 = arith.constant 64 : index
      %40 = vector.load %arg5[%c0_28, %c64] : memref<1x128xf32, #tpu.memory_space<vmem>>, vector<1x32xf32>
      %cst_29 = arith.constant 0.00520833349 : f32
      %41 = vector.broadcast %cst_29 : f32 to vector<1x32xf32>
      %42 = arith.mulf %40, %41 : vector<1x32xf32>
      %cst_30 = arith.constant dense<0.000000e+00> : vector<1x8xf32>
      %43 = tpu.matmul %42, %12, %cst_30 {dimension_numbers = #tpu.dot_dimension_numbers<[1], [0], [0], [1], [0, 0, 1, 1], [], []>} : vector<1x32xf32>, vector<32x8xf32>, vector<1x8xf32> -> vector<1x8xf32>
      %cst_31 = arith.constant 0.000000e+00 : f32
      %44 = vector.broadcast %cst_31 : f32 to vector<1x8xf32>
      %45 = arith.maximumf %43, %44 : vector<1x8xf32>
      %cst_32 = arith.constant dense<0.000000e+00> : vector<1x32xf32>
      %46 = tpu.matmul %45, %13, %cst_32 {dimension_numbers = #tpu.dot_dimension_numbers<[1], [0], [0], [1], [0, 0, 1, 1], [], []>} : vector<1x8xf32>, vector<8x32xf32>, vector<1x32xf32> -> vector<1x32xf32>
      %47 = arith.negf %46 : vector<1x32xf32>
      %48 = math.exp %47 : vector<1x32xf32>
      %cst_33 = arith.constant 1.000000e+00 : f32
      %49 = vector.broadcast %cst_33 : f32 to vector<1x32xf32>
      %50 = arith.addf %49, %48 : vector<1x32xf32>
      %51 = arith.divf %49, %50 : vector<1x32xf32>
      %c0_34 = arith.constant 0 : index
      %c64_35 = arith.constant 64 : index
      %52 = vector.load %arg4[%c0_34, %c64_35] : memref<1x128xf32, #tpu.memory_space<vmem>>, vector<1x32xf32>
      tpu.vector_store %arg4[%c0_34, %c64_35], %51 {strides = array<i32>} : memref<1x128xf32, #tpu.memory_space<vmem>>, vector<1x32xf32>,
      %c0_36 = arith.constant 0 : index
      %c96 = arith.constant 96 : index
      %53 = vector.load %arg5[%c0_36, %c96] : memref<1x128xf32, #tpu.memory_space<vmem>>, vector<1x32xf32>
      %cst_37 = arith.constant 0.00520833349 : f32
      %54 = vector.broadcast %cst_37 : f32 to vector<1x32xf32>
      %55 = arith.mulf %53, %54 : vector<1x32xf32>
      %cst_38 = arith.constant dense<0.000000e+00> : vector<1x8xf32>
      %56 = tpu.matmul %55, %12, %cst_38 {dimension_numbers = #tpu.dot_dimension_numbers<[1], [0], [0], [1], [0, 0, 1, 1], [], []>} : vector<1x32xf32>, vector<32x8xf32>, vector<1x8xf32> -> vector<1x8xf32>
      %cst_39 = arith.constant 0.000000e+00 : f32
      %57 = vector.broadcast %cst_39 : f32 to vector<1x8xf32>
      %58 = arith.maximumf %56, %57 : vector<1x8xf32>
      %cst_40 = arith.constant dense<0.000000e+00> : vector<1x32xf32>
      %59 = tpu.matmul %58, %13, %cst_40 {dimension_numbers = #tpu.dot_dimension_numbers<[1], [0], [0], [1], [0, 0, 1, 1], [], []>} : vector<1x8xf32>, vector<8x32xf32>, vector<1x32xf32> -> vector<1x32xf32>
      %60 = arith.negf %59 : vector<1x32xf32>
      %61 = math.exp %60 : vector<1x32xf32>
      %cst_41 = arith.constant 1.000000e+00 : f32
      %62 = vector.broadcast %cst_41 : f32 to vector<1x32xf32>
      %63 = arith.addf %62, %61 : vector<1x32xf32>
      %64 = arith.divf %62, %63 : vector<1x32xf32>
      %c0_42 = arith.constant 0 : index
      %c96_43 = arith.constant 96 : index
      %65 = vector.load %arg4[%c0_42, %c96_43] : memref<1x128xf32, #tpu.memory_space<vmem>>, vector<1x32xf32>
      tpu.vector_store %arg4[%c0_42, %c96_43], %64 {strides = array<i32>} : memref<1x128xf32, #tpu.memory_space<vmem>>, vector<1x32xf32>,
    } else {
    }
    return
  }
  func.func @transform_0(%arg0: i32) -> (i32, i32) {
    %c0_i32 = arith.constant 0 : i32
    %c0_i32_0 = arith.constant 0 : i32
    return %arg0, %c0_i32 : i32, i32
  }
  func.func @transform_1(%arg0: i32) -> (i32, i32) {
    %c0_i32 = arith.constant 0 : i32
    %c0_i32_0 = arith.constant 0 : i32
    %c0_i32_1 = arith.constant 0 : i32
    return %c0_i32, %c0_i32_0 : i32, i32
  }
  func.func @transform_2(%arg0: i32) -> (i32, i32) {
    %c0_i32 = arith.constant 0 : i32
    %c0_i32_0 = arith.constant 0 : i32
    %c0_i32_1 = arith.constant 0 : i32
    return %c0_i32, %c0_i32_0 : i32, i32
  }
  func.func @transform_3(%arg0: i32) -> (i32, i32) {
    %c0_i32 = arith.constant 0 : i32
    %c0_i32_0 = arith.constant 0 : i32
    %c0_i32_1 = arith.constant 0 : i32
    return %c0_i32, %c0_i32_0 : i32, i32
  }
}

</mosaic_0001>

<bundles_post_ra>
// kernel: tpu_custom_call.1
= control target key start
LH: loop header
LB: loop body
LE: loop exit
PB: predicated region body
PF: predicated region fallthrough
CT: control target
= control target key end

     0   :  { %8 = vsyncpa [#allocation4], 0  ;;  %s1471_s0 = inlined_call_operand.hbm [shape: f32[192,128], index: 0, kind: input, shape index: {}]   ;;  %s1472_s1 = inlined_call_operand.vmem [shape: f32[32,8], index: 1, kind: input, shape index: {}]   ;;  %s1473_s2 = inlined_call_operand.vmem [shape: f32[8,32], index: 2, kind: input, shape index: {}]   ;;  %s1474_s3 = inlined_call_operand.hbm [shape: f32[1,128], index: 3, kind: output, shape index: {}]  }
   0x1   :  { %10 = vsyncpa [#allocation4 + $0x1], 0 }
   0x2   :  { %11 = vsyncpa [#allocation5], 0  ;;  %s1274_s12 = smov 0   ;;  %s1276_s13 = smov 0  }
   0x3   :  { %s1278_s14 = smov 0   ;;  %s1280_s15 = smov 0  }
   0x4 LB: > { %s1293_s16 = sadd.s32 4294967295, %s1241_s15   ;;  %s1296_s17 = sadd.s32 1, %s1241_s15   ;;  %s1241_s15 = sphi %s1280_s15, %s1481_s15   ;;  %s1237_s14 = sphi %s1278_s14, %s1480_s14   ;;  %s1233_s13 = sphi %s1276_s13, %s1479_s13   ;;  %s1229_s12 = sphi %s1274_s12, %s1478_s12  }
   0x5   : > { %s21_s18 = ssub.s32 %s1241_s15, %s1296_s17  ;;  %s24_s19 = sadd.s32 1, %s1237_s14 }
   0x6   : > { %p22_p0 = scmp.eq.s32.totalorder %s21_s18, 0  ;;  %p31_p1 = scmp.ne.s32.totalorder %s1237_s14, %s1233_s13 }
   0x7   : > { %p32_p2 = scmp.eq.s32.totalorder %s1241_s15, 0  ;;  %p37_p3 = scmp.ne.s32.totalorder %s1233_s13, %s1229_s12 }
   0x8   : > { %s1306_s20 = scalar_select %p22_p0, %s1237_s14, %s24_s19  }
   0x9   : > { %p33_p4 = por %p32_p2, %p31_p1  ;;  %p38_p5 = scmp.eq.s32.totalorder %s1293_s16, 0 }
   0xa   : > { %p1086_p6 = scmp.lt.s32.totalorder %s1241_s15, 3  ;;  %s130_s22 = sand.u32 1, %s1237_s14  }
   0xb   : > { %p1310_p7 = por %p38_p5, %p37_p3  ;;  %s936_s23 = sshll.u32 %s130_s22, 6 }
   0xc   : > { %s959_s24 = sshll.u32 %s1241_s15, 10  ;;  %s134_s28 = scalar_lea.vmem [#allocation3], %s936_s23 }
   0xd   : > { %s1319_s27 = scalar_lea.hbm %s1471_s0, %s959_s24  ;;  %s141_s29 = sshll.u32 %s134_s28, 4  ;;  %s1321_s29 = int_to_ptr.vmem [resolvable:$true] %s141_s29 }
   0xe   : > { %p1323_p8 = pnand %p1086_p6, %p33_p4  ;;  %s1328_s4 = scalar_lea.sflag [#allocation4], %s130_s22 }
   0xf   : > { %s1147_s5 = scalar_lea.hbm %s1319_s27, 1024  ;;  %s1152_s8 = scalar_lea.hbm %s1471_s0, 3072 }
  0x10   : > { %p1148_p10 = scmp.ne.s32.totalorder %s1319_s27, %s1147_s5  ;;  %p1149_p11 = pneg %p1323_p8 }
  0x11   : > { %p1153_p0 = scmp.lt.u32.totalorder %s1319_s27, %s1471_s0  ;;  %p1154_p1 = scmp.lt.u32.totalorder %s1152_s8, %s1147_s5 }
  0x12   : > { %p1150_p12 = pnand %p1149_p11, %p1148_p10  ;;  %p1156_p3 = scmp.lt.u32.totalorder %s1147_s5, %s1319_s27 }
  0x13   : > { %p1155_p2 = por %p1154_p1, %p1153_p0 }
  0x14   : > { %p1151_p13 = pneg %p1150_p12 }
  0x15   : > { %p1157_p4 = por %p1156_p3, %p1155_p2 }
  0x17   : > { %p1158_p5 = pnand %p1157_p4, %p1151_p13 }
  0x19   : > { %1161 = shalt.err (!%p1158_p5)
}
  0x1a   : > { %s1162_s11 = scalar_lea.vmem %s1321_s29, 1024  ;;  %s1243_s12 = smov [#allocation3]  }
  0x1b   : > { %p1163_p6 = scmp.ne.s32.totalorder %s1321_s29, %s1162_s11  ;;  %s1167_s18 = sshll.u32 %s1243_s12, 4  ;;  %s1168_s18 = int_to_ptr.vmem [resolvable:$false] %s1167_s18 }
  0x1c   : > { %s1169_s19 = scalar_lea.vmem %s1168_s18, 2048  ;;  %p1170_p9 = scmp.lt.s32.totalorder %s1321_s29, %s1168_s18 }
  0x1d   : > { %p1165_p10 = pnand %p1163_p6, %p1149_p11  ;;  %p1171_p0 = scmp.lt.s32.totalorder %s1169_s19, %s1162_s11 }
  0x1f   : > { %p1166_p12 = pneg %p1165_p10  ;;  %p1172_p1 = por %p1171_p0, %p1170_p9 }
  0x21   : > { %p1173_p2 = pnand %p1172_p1, %p1166_p12 }
  0x23   : > { %1176 = shalt.err (!%p1173_p2)
}
  0x24   : > { %s1244_s22 = smov 128   ;;  %s1245_s23 = smov 8  }
  0x25   : > { %1085 = dma.hbm_to_vmem [thread:$0]  (!%p1323_p8), %s1319_s27, 1024, %s1321_s29, %s1328_s4, %s1244_s22, %s1244_s22, %s1245_s23  }
  0x26   : > { %p149_p11 = scmp.lt.s32.totalorder %s1241_s15, 4  ;;  %p1477_p13 = scmp.ge.s32.totalorder %s1241_s15, 1 }
  0x28   : > { %p150_p3 = pnand %p1477_p13, %p149_p11 }
  0x29   : > { %s155_s24 = sand.u32 (!%p150_p3), 1, %s1233_s13  }
  0x2a   : > { %153 = sbr.rel (%p150_p3) target bundleno = 1144 (0x478), region = 32  ;;  %s940_s25 = sshll.u32 (!%p150_p3), %s155_s24, 6 }
  0x2b   : > { %s156_s26 = scalar_lea.sflag (!%p150_p3), [#allocation4], %s155_s24  ;;  %s159_s28 = scalar_lea.vmem (!%p150_p3), [#allocation3], %s940_s25 }
  0x31   : > { %1220 = dma.done.wait (%p1310_p7), %s156_s26, 1024  }
  0x32   : > { %1222 = vsyncadd (%p1310_p7), %s156_s26, 4294966272  ;;  %p941_p9 = scmp.ne.s32.totalorder %s1293_s16, 0 }
  0x33   : > { %v1246_v0 = vmov (!%p941_p9), 0.0  }
  0x34   : > { %181 = sbr.rel (%p941_p9) target bundleno = 59 (0x3b), region = 40  ;;  %182 = vst [vmem:[#allocation2] sm:$0x1] (!%p941_p9), %v1246_v0 }
  0x3b PF: > { %v183_v1 = vld [vmem:[%s159_s28] sm:$0xff]  ;;  %v184_v2 = vld [vmem:[%s159_s28 + $0x8] sm:$0xff]  ;;  %v185_v3 = vld [vmem:[%s159_s28 + $0x10] sm:$0xff]  ;;  %p942_p7 = scmp.ne.s32.totalorder %s1293_s16, 2 }
  0x3c   : > { %v192_v4 = vadd.f32 %v184_v2, %v183_v1  ;;  %v186_v5 = vld [vmem:[%s159_s28 + $0x18] sm:$0xff]  ;;  %v187_v7 = vld [vmem:[%s159_s28 + $0x20] sm:$0xff]  ;;  %v188_v9 = vld [vmem:[%s159_s28 + $0x28] sm:$0xff]  ;;  %v378_v27 = vlaneseq (!%p942_p7)  ;;  %v1247_v28 = vmov (!%p942_p7), 0.0|0.0   ;;  %vm1248_vm0 = vmmov (!%p942_p7), 0   ;;  %s1250_s7 = smov (!%p942_p7), 96  }
  0x3d   : > { %v189_v11 = vld [vmem:[%s159_s28 + $0x30] sm:$0xff]  ;;  %v190_v13 = vld [vmem:[%s159_s28 + $0x38] sm:$0xff]  ;;  %v212_v25 = vld [vmem:[%s1472_s1 + $0x8] sm:$0xff] (!%p942_p7)  ;;  %1052 = vmatprep.subr.bf16.mxu0 (!%p942_p7), %v1247_v28  ;;  %v1249_v31 = vmov (!%p942_p7), 0.0   ;;  %vm218_vm1 = vcmask (!%p942_p7), 261120   ;;  %s1251_s8 = smov (!%p942_p7), 64  }
  0x3e   : > { %v193_v6 = vadd.f32 %v192_v4, %v185_v3  ;;  %v191_v21 = vld [vmem:[#allocation2] sm:$0x1]  ;;  %v213_v26 = vld [vmem:[%s1472_s1 + $0x10] sm:$0xff] (!%p942_p7)  ;;  %v214_v30 = vld [vmem:[%s1472_s1 + $0x18] sm:$0xff] (!%p942_p7)  ;;  %996 = vmatprep.mubr.msk.f32.mxu0 (!%p942_p7), %vm1248_vm0, %v1249_v31  ;;  %v379_v34 = vshrl.u32 (!%p942_p7), %v378_v27, 7  ;;  %999 = vmatprep.subr.mxu1 (!%p942_p7), %v1249_v31  ;;  %s1252_s11 = smov (!%p942_p7), 32  }
  0x3f   : > { %v211_v24 = vld [vmem:[%s1472_s1] sm:$0xff] (!%p942_p7)  ;;  %1001 = vmatprep.mubr.msk.f32.mxu1 (!%p942_p7), %vm1248_vm0, %v1249_v31  ;;  %v1387_v35 = vpack.c.bf16 (!%p942_p7), %v214_v30, %v213_v26  ;;  %vm293_vm2 = vcmask (!%p942_p7), 64512   ;;  %vm373_vm3 = vcmask (!%p942_p7), 253952   ;;  %vm540_vm4 = vcmask (!%p942_p7), 516352  }
  0x40   : > { %v194_v8 = vadd.f32 %v193_v6, %v186_v5  ;;  %v1376_v29 = vpack.c.bf16 (!%p942_p7), %v212_v25, %v211_v24  ;;  %v380_v38 = vsub.s32 (!%p942_p7), 0, %v379_v34  ;;  %v215_v43 = vld [vmem:[%s1473_s2] sm:$0xff] (!%p942_p7)  ;;  %vm707_vm5 = vcmask (!%p942_p7), 778752  }
  0x41   : > { %1000 = vmatpush3.msra.mxu1 (!%p942_p7), %v215_v43  ;;  %vm874_vm6 = vcmask (!%p942_p7), 1041152  }
  0x42   : > { %v195_v10 = vadd.f32 %v194_v8, %v187_v7  ;;  %1054 = vmatpush3.bf16.msra.mxu0 (!%p942_p7), %v1376_v29  ;;  %1058 = vmatprep.subr.bf16.mxu1 (!%p942_p7), %v1247_v28 }
  0x43   : > { %1055 = vmatprep.subr.bf16.mxu0 (!%p942_p7), %v1247_v28 }
  0x44   : > { %v196_v12 = vadd.f32 %v195_v10, %v188_v9 }
  0x46   : > { %v197_v14 = vadd.f32 %v196_v12, %v189_v11  ;;  %1057 = vmatpush3.bf16.msra.mxu0 (!%p942_p7), %v1387_v35 }
  0x47   : > { %1015 = vmatprep.subr.mxu0 (!%p942_p7), %v1249_v31 }
  0x48   : > { %v198_v15 = vadd.f32 %v197_v14, %v190_v13 }
  0x4a   : > { %v199_v16 = vrot.slane %v198_v15, 4 }
  0x4c   : > { %v200_v17 = vadd.f32 %v199_v16, %v198_v15 }
  0x4e   : > { %v201_v18 = vrot.slane %v200_v17, 2 }
  0x50   : > { %v202_v19 = vadd.f32 %v201_v18, %v200_v17 }
  0x52   : > { %v203_v20 = vrot.slane %v202_v19, 1  ;;  %210 = sbr.rel (%p942_p7) target bundleno = 1119 (0x45f), region = 44 }
  0x54   : > { %v204_v22 = vadd.f32 %v203_v20, %v202_v19 }
  0x56   : > { %v205_v23 = vadd.f32 %v204_v22, %v191_v21 }
  0x58   : > { %206 = vst [vmem:[#allocation2] sm:$0x1] %v205_v23 }
  0x5f   : > { %v375_v32 = vld [vmem:[#allocation2] sm:$0x1] }
  0x60   : > { %v376_v33 = vmul.f32 0.0052083335, %v375_v32  ;;  %v216_v36 = vld [vmem:[#allocation2] sm:$0x1] }
  0x61   : > { %v542_v37 = vld [vmem:[#allocation2] sm:$0x1]  ;;  %v217_v40 = vmul.f32 0.0052083335, %v216_v36 }
  0x62   : > { %v543_v39 = vmul.f32 0.0052083335, %v542_v37  ;;  %v381_v41 = vrot.slane %v376_v33, %v380_v38  ;;  %v709_v44 = vld [vmem:[#allocation2] sm:$0x1] }
  0x63   : > { %997 = vmatmul.mubr.msk.f32.vlgmr.msra.gmra.mrb[0].mxu0 %vm218_vm1, %v217_v40  ;;  %v710_v45 = vmul.f32 0.0052083335, %v709_v44 }
  0x64   : > { %382 = vrot.lane.b32.xlu0 %v381_v41, %s1250_s7  ;;  %v548_v42 = vrot.slane %v543_v39, %v380_v38  ;;  %1017 = vmatprep.mubr.msk.f32.mxu0 %vm1248_vm0, %v1249_v31 }
  0x65   : > { %1016 = vmatpush3.msra.mxu0 %v215_v43  ;;  %v715_v46 = vrot.slane %v710_v45, %v380_v38 }
  0x66   : > { %1031 = vmatprep.subr.mxu0 %v1249_v31 }
  0x67   : > { %716 = vrot.lane.b32.xlu1 %v715_v46, %s1252_s11 }
  0x68   : > { %549 = vrot.lane.b32.xlu0 %v548_v42, %s1251_s8 }
  0xd6   : > { %v383_v50 = vpop.permute.xlu0 %382 }
  0xd9   : > { %v717_v63 = vpop.permute.xlu1 %716 }
  0xda   : > { %v550_v51 = vpop.permute.xlu0 %549 }
 0x136   : > { %v288_v47 = vpop.f32.mrb[0].mxu0 }
 0x137   : > { %v292_v48 = vmax.f32 %v288_v47, 0.0  ;;  %v998_v49 = vpop.f32.mrb[1].mxu0 }
 0x139   : > { %1002 = vmatmul.mubr.msk.f32.vlgmr.msra.gmra.mrb[0].mxu1 %vm293_vm2, %v292_v48 }
 0x13a   : > { %1060 = vmatpush3.bf16.msra.mxu1 %v1376_v29  ;;  %1012 = vmatprep.mubr.msk.f32.mxu1 %vm1248_vm0, %v1249_v31 }
 0x13b   : > { %1061 = vmatprep.subr.bf16.mxu1 %v1247_v28 }
 0x13e   : > { %1063 = vmatpush3.bf16.msra.mxu1 %v1387_v35 }
 0x13f   : > { %1064 = vmatprep.subr.bf16.mxu1 %v1247_v28 }
 0x141   : > { %1013 = vmatmul.mubr.msk.f32.vlgmr.msra.gmra.mrb[2].mxu1 %vm218_vm1, %v383_v50 }
 0x142   : > { %1066 = vmatpush3.bf16.msra.mxu1 %v1376_v29  ;;  %1028 = vmatprep.mubr.msk.f32.mxu1 %vm1248_vm0, %v1249_v31 }
 0x143   : > { %1067 = vmatprep.subr.bf16.mxu1 %v1247_v28 }
 0x146   : > { %1069 = vmatpush3.bf16.msra.mxu1 %v1387_v35 }
 0x147   : > { %1047 = vmatprep.subr.mxu1 %v1249_v31 }
 0x149   : > { %1029 = vmatmul.mubr.msk.f32.vlgmr.msra.gmra.mrb[4].mxu1 %vm218_vm1, %v550_v51 }
 0x14a   : > { %1048 = vmatpush3.msra.mxu1 %v215_v43  ;;  %1049 = vmatprep.mubr.msk.f32.mxu1 %vm1248_vm0, %v1249_v31 }
 0x20c   : > { %v363_v52 = vpop.f32.mrb[0].mxu1 }
 0x20d   : > { %v945_v53 = vmul.f32 -1.442695, %v363_v52  ;;  %v1003_v54 = vpop.f32.mrb[1].mxu1 }
 0x20f   : > { %1131 = vpow2.f32 %v945_v53 }
 0x214   : > { %v452_v55 = vpop.f32.mrb[2].mxu1 }
 0x215   : > { %v456_v56 = vmax.f32 %v452_v55, 0.0  ;;  %v1014_v57 = vpop.f32.mrb[3].mxu1 }
 0x217   : > { %1018 = vmatmul.mubr.msk.f32.vlgmr.msra.gmra.mrb[2].mxu0 %vm293_vm2, %v456_v56 }
 0x218   : > { %1032 = vmatpush3.msra.mxu0 %v215_v43  ;;  %1033 = vmatprep.mubr.msk.f32.mxu0 %vm1248_vm0, %v1249_v31 }
 0x219   : > { %v1132_v58 = vpop.eup %1131  ;;  %1070 = vmatprep.subr.bf16.mxu0 %v1247_v28 }
 0x21a   : > { %v370_v59 = vadd.f32 1.0, %v1132_v58 }
 0x21c   : > { %1133 = vrcp.f32 %v370_v59  ;;  %v619_v60 = vpop.f32.mrb[4].mxu1 }
 0x21d   : > { %v623_v61 = vmax.f32 %v619_v60, 0.0  ;;  %v1030_v62 = vpop.f32.mrb[5].mxu1 }
 0x21f   : > { %1034 = vmatmul.mubr.msk.f32.vlgmr.msra.gmra.mrb[4].mxu0 %vm293_vm2, %v623_v61 }
 0x220   : > { %1072 = vmatpush3.bf16.msra.mxu0 %v1376_v29  ;;  %1044 = vmatprep.mubr.msk.f32.mxu0 %vm1248_vm0, %v1249_v31 }
 0x221   : > { %1073 = vmatprep.subr.bf16.mxu0 %v1247_v28 }
 0x224   : > { %1075 = vmatpush3.bf16.msra.mxu0 %v1387_v35 }
 0x226   : > { %v1134_v0 = vpop.eup %1133 }
 0x227   : > { %1045 = vmatmul.mubr.msk.f32.vlgmr.msra.gmra.mrb[6].mxu0 %vm218_vm1, %v717_v63  ;;  %374 = vst.msk [vmem:[#allocation6] sm:$0x1] %vm373_vm3, %v1134_v0 }
 0x2ea   : > { %v526_v1 = vpop.f32.mrb[2].mxu0 }
 0x2eb   : > { %v948_v2 = vmul.f32 -1.442695, %v526_v1  ;;  %v1019_v3 = vpop.f32.mrb[3].mxu0 }
 0x2ed   : > { %1135 = vpow2.f32 %v948_v2 }
 0x2f2   : > { %v693_v4 = vpop.f32.mrb[4].mxu0 }
 0x2f3   : > { %v951_v5 = vmul.f32 -1.442695, %v693_v4  ;;  %v1035_v6 = vpop.f32.mrb[5].mxu0 }
 0x2f5   : > { %1137 = vpow2.f32 %v951_v5 }
 0x2f7   : > { %v1136_v7 = vpop.eup %1135 }
 0x2f8   : > { %v533_v8 = vadd.f32 1.0, %v1136_v7 }
 0x2fa   : > { %1139 = vrcp.f32 %v533_v8  ;;  %v786_v9 = vpop.f32.mrb[6].mxu0 }
 0x2fb   : > { %v790_v10 = vmax.f32 %v786_v9, 0.0  ;;  %v1046_v11 = vpop.f32.mrb[7].mxu0 }
 0x2fd   : > { %1050 = vmatmul.mubr.msk.f32.vlgmr.msra.gmra.mrb[6].mxu1 %vm293_vm2, %v790_v10 }
 0x2ff   : > { %v1138_v12 = vpop.eup %1137 }
 0x300   : > { %v700_v13 = vadd.f32 1.0, %v1138_v12 }
 0x302   : > { %1141 = vrcp.f32 %v700_v13 }
 0x304   : > { %v1140_v14 = vpop.eup %1139 }
 0x305   : > { %537 = vrot.lane.b32.xlu1 %v1140_v14, %s1252_s11 }
 0x30c   : > { %v1142_v15 = vpop.eup %1141 }
 0x30d   : > { %704 = vrot.lane.b32.xlu0 %v1142_v15, %s1251_s8 }
 0x377   : > { %v538_v16 = vpop.permute.xlu1 %537 }
 0x378   : > { %541 = vst.msk [vmem:[#allocation6] sm:$0x1] %vm540_vm4, %v538_v16 }
 0x37f   : > { %v705_v17 = vpop.permute.xlu0 %704 }
 0x380   : > { %708 = vst.msk [vmem:[#allocation6] sm:$0x1] %vm707_vm5, %v705_v17 }
 0x3d0   : > { %v860_v18 = vpop.f32.mrb[6].mxu1 }
 0x3d1   : > { %v954_v19 = vmul.f32 -1.442695, %v860_v18  ;;  %v1051_v20 = vpop.f32.mrb[7].mxu1 }
 0x3d3   : > { %1143 = vpow2.f32 %v954_v19 }
 0x3dd   : > { %v1144_v21 = vpop.eup %1143 }
 0x3de   : > { %v867_v22 = vadd.f32 1.0, %v1144_v21 }
 0x3e0   : > { %1145 = vrcp.f32 %v867_v22 }
 0x3ea   : > { %v1146_v23 = vpop.eup %1145 }
 0x3eb   : > { %871 = vrot.lane.b32.xlu1 %v1146_v23, %s1250_s7 }
 0x45d   : > { %v872_v24 = vpop.permute.xlu1 %871 }
 0x45e   : > { %875 = vst.msk [vmem:[#allocation6] sm:$0x1] %vm874_vm6, %v872_v24 }
 0x45f PF: > { %p1087_p8 = scmp.eq.s32.totalorder %s1293_s16, 2  ;;  %s1253_s12 = smov [#allocation6]  }
 0x460   : > { %s883_s18 = sshll.u32 %s1253_s12, 4  ;;  %s884_s18 = int_to_ptr.vmem [resolvable:$true] %s883_s18 }
 0x461   : > { %s1177_s19 = scalar_lea.vmem %s884_s18, 16  ;;  %s1183_s22 = scalar_lea.vmem %s884_s18, 32 }
 0x462   : > { %p1178_p4 = scmp.ne.s32.totalorder %s884_s18, %s1177_s19  ;;  %p1184_p10 = scmp.lt.s32.totalorder %s884_s18, %s884_s18 }
 0x463   : > { %p1185_p12 = scmp.lt.s32.totalorder %s1183_s22, %s1177_s19 }
 0x464   : > { %p1179_p5 = pnand %p1178_p4, %p1087_p8 }
 0x465   : > { %p1186_p0 = por %p1185_p12, %p1184_p10 }
 0x466   : > { %p1180_p6 = pneg %p1179_p5 }
 0x468   : > { %p1187_p1 = pnand %p1186_p0, %p1180_p6 }
 0x46a   : > { %1190 = shalt.err (!%p1187_p1)
}
 0x46b   : > { %s1191_s25 = scalar_lea.hbm %s1474_s3, 16 }
 0x46c   : > { %p1192_p2 = scmp.ne.s32.totalorder %s1474_s3, %s1191_s25  ;;  %p1197_p3 = scmp.lt.u32.totalorder %s1191_s25, %s1474_s3 }
 0x46e   : > { %p1193_p11 = pnand %p1192_p2, %p1087_p8 }
 0x470   : > { %p1194_p13 = pneg %p1193_p11 }
 0x472   : > { %p1199_p9 = pnand %p1197_p3, %p1194_p13 }
 0x474   : > { %1202 = shalt.err (!%p1199_p9)
}
 0x475   : > { %1079 = dma.vmem_to_hbm [thread:$0]  (%p1087_p8), %s884_s18, 16, %s1474_s3, [#allocation5]  }
 0x476   : > { %1224 = dma.done.wait (%p1087_p8), [#allocation5], 16  }
 0x477   : > { %1226 = vsyncadd (%p1087_p8), [#allocation5], 4294967280 }
 0x478 PF: > { %p14_p7 = scmp.ge.s32.totalorder %s1296_s17, 5   ;;  %s1478_s12 = smov %s1233_s13 }
 0x479   : > { %s1479_s13 = smov %s1237_s14  ;;  %s1480_s14 = smov %s1306_s20 }
 0x47a   : > { %s1481_s15 = smov %s1296_s17  ;;  %16 = sbr.rel (!%p14_p7) target bundleno = 4 (0x4), region = 77 }
 0x481   :  { %896 = vsyncpa [#allocation4], 1 }
 0x482   :  { %898 = vsyncpa [#allocation4 + $0x1], 1 }
 0x483   :  { %899 = vsyncpa [#allocation5], 1 }
 0x484   :  { %901 = vsyncpa [#allocation5 + $0x1], 1 }

</bundles_post_ra>
